<compile_context>
chip_gen: v7x
topology: tpu7x:2x2x1
jax: 0.10.0
libtpu: 0.0.40
codegen_flags: <defaults>
</compile_context>

<pallas_src>
import functools
import math

import jax
import jax.numpy as jnp
from jax.experimental import pallas as pl
from jax.experimental.pallas import tpu as pltpu


def _flash_attn_kernel(xq_ref, xkv_ref, wq_ref, wkv_ref, bq_ref, bkv_ref,
                       o_ref, q_scr, m_scr, l_scr, acc_scr, *, scale, d_emb):
    ki = pl.program_id(2)

    tb, tq, d_in = xq_ref.shape
    tk = xkv_ref.shape[1]

    # ---- once per (batch-tile, q-tile): project Q (pre-scaled) and reset state
    @pl.when(ki == 0)
    def _init():
        xq = xq_ref[...].reshape(tb * tq, d_in)          # fold batch into sublanes
        q = jnp.dot(xq, wq_ref[...], preferred_element_type=jnp.float32)
        q = (q + bq_ref[...]) * scale                    # bias in f32, scale on q
        q_scr[...] = q.reshape(tb, tq, d_emb).astype(q_scr.dtype)
        m_scr[...] = jnp.full(m_scr.shape, -jnp.inf, dtype=m_scr.dtype)
        l_scr[...] = jnp.zeros(l_scr.shape, dtype=l_scr.dtype)
        acc_scr[...] = jnp.zeros(acc_scr.shape, dtype=acc_scr.dtype)

    # ---- fused K/V projection for this KV tile (one MXU push, 2*D_emb lanes)
    xkv = xkv_ref[...].reshape(tb * tk, d_in)
    kv = jnp.dot(xkv, wkv_ref[...], preferred_element_type=jnp.float32) + bkv_ref[...]
    k = kv[:, :d_emb].reshape(tb, tk, d_emb).astype(xkv_ref.dtype)
    v = kv[:, d_emb:].reshape(tb, tk, d_emb).astype(xkv_ref.dtype)

    # ---- scores: contract the embedding dims directly (no explicit transpose)
    q = q_scr[...]
    s = jnp.einsum("bqd,bkd->bqk", q, k, preferred_element_type=jnp.float32)

    # ---- online softmax update
    m_prev = m_scr[...]
    m_new = jnp.maximum(m_prev, jnp.max(s, axis=-1, keepdims=True))
    alpha = jnp.exp(m_prev - m_new)
    p = jnp.exp(s - m_new)
    l_scr[...] = alpha * l_scr[...] + jnp.sum(p, axis=-1, keepdims=True)
    acc_scr[...] = alpha * acc_scr[...] + jnp.einsum(
        "bqk,bkd->bqd", p.astype(v.dtype), v, preferred_element_type=jnp.float32)
    m_scr[...] = m_new

    # ---- finalize: normalize and write the output tile
    @pl.when(ki == pl.num_programs(2) - 1)
    def _finalize():
        inv_l = pl.reciprocal(l_scr[...], approx=True)   # EUP slot
        o_ref[...] = (acc_scr[...] * inv_l).astype(o_ref.dtype)


def _pick_seq_tile(s, cap=256):
    """Largest power-of-two tile (<= cap) dividing s; else the full length."""
    if s <= cap:
        return s
    t = cap
    while t >= 8:
        if s % t == 0:
            return t
        t //= 2
    return s


def attention_layer(x, wq, wk, wv, bq, bk, bv):
    """x: (B, S, D_in); w*: (D_in, D_emb); b*: (D_emb,). Returns (B, S, D_emb)."""
    B, S, D_in = x.shape
    D_emb = wq.shape[1]
    scale = 1.0 / math.sqrt(float(D_in))          # matches x.size(-1) ** 0.5

    dt = x.dtype
    wq_ = wq.astype(dt)
    wkv = jnp.concatenate([wk, wv], axis=1).astype(dt)           # (D_in, 2*D_emb)
    bq2 = bq.reshape(1, D_emb).astype(jnp.float32)
    bkv2 = jnp.concatenate([bk, bv]).reshape(1, 2 * D_emb).astype(jnp.float32)

    TQ = _pick_seq_tile(S)
    TK = _pick_seq_tile(S)
    # Fold the whole batch into one grid step when the problem is small and the
    # sequence tiles keep sublane (8) alignment (makes in-kernel reshapes layout-safe).
    TB = B if (TQ % 8 == 0 and TK % 8 == 0 and B * max(TQ, TK) <= 512) else 1
    grid = (B // TB, S // TQ, S // TK)

    kernel = functools.partial(_flash_attn_kernel, scale=scale, d_emb=D_emb)

    # Explicit VMEM budget: double-buffered inputs/outputs + scratch, with 2x
    # headroom, clamped below v7x's 64 MiB physical VMEM.
    isz = x.dtype.itemsize
    est = 2 * TB * (TQ + TK) * D_in * isz          # xq / xkv (double-buffered)
    est += 2 * D_in * 3 * D_emb * isz              # Wq + [Wk|Wv]
    est += 2 * 3 * D_emb * 4                       # biases (f32)
    est += 2 * TB * TQ * D_emb * isz               # output tile
    est += TB * TQ * (D_emb * (isz + 4) + 8)       # scratch: q, acc, m, l
    vmem_limit = int(min(max(2 * est, 32 * 1024 * 1024), 56 * 1024 * 1024))

    # TODO(synk): output last dim is D_emb (<128 here) so writes stay lane-masked;
    # the module's output shape fixes this, so no repacking is done.
    return pl.pallas_call(
        kernel,
        out_shape=jax.ShapeDtypeStruct((B, S, D_emb), x.dtype),
        grid_spec=pltpu.PrefetchScalarGridSpec(
            num_scalar_prefetch=0,
            grid=grid,
            in_specs=[
                pl.BlockSpec((TB, TQ, D_in), lambda bi, qi, ki: (bi, qi, 0)),  # x (Q rows)
                pl.BlockSpec((TB, TK, D_in), lambda bi, qi, ki: (bi, ki, 0)),  # x (KV rows)
                pl.BlockSpec((D_in, D_emb), lambda bi, qi, ki: (0, 0)),        # Wq
                pl.BlockSpec((D_in, 2 * D_emb), lambda bi, qi, ki: (0, 0)),    # [Wk|Wv]
                pl.BlockSpec((1, D_emb), lambda bi, qi, ki: (0, 0)),           # bq
                pl.BlockSpec((1, 2 * D_emb), lambda bi, qi, ki: (0, 0)),       # [bk|bv]
            ],
            out_specs=pl.BlockSpec((TB, TQ, D_emb), lambda bi, qi, ki: (bi, qi, 0)),
            scratch_shapes=[
                pltpu.VMEM((TB, TQ, D_emb), x.dtype),      # pre-scaled Q tile
                pltpu.VMEM((TB, TQ, 1), jnp.float32),      # running max m
                pltpu.VMEM((TB, TQ, 1), jnp.float32),      # running denom l
                pltpu.VMEM((TB, TQ, D_emb), jnp.float32),  # output accumulator
            ],
        ),
        compiler_params=pltpu.CompilerParams(
            dimension_semantics=("parallel", "parallel", "arbitrary"),
            vmem_limit_bytes=vmem_limit,
        ),
    )(x, x, wq_, wkv, bq2, bkv2)


def _reference(x, wq, wk, wv, bq, bk, bv):
    q = x @ wq + bq
    k = x @ wk + bk
    v = x @ wv + bv
    scores = jnp.einsum("bsd,btd->bst", q, k) / math.sqrt(x.shape[-1])
    p = jax.nn.softmax(scores, axis=-1)
    return jnp.einsum("bst,btd->bsd", p, v)


if __name__ == "__main__":
    # Small shapes consistent with the module: batch=2, seq=8, input=32, embed=32
    B, S, D_in, D_emb = 2, 8, 32, 32
    key = jax.random.PRNGKey(0)
    kx, kwq, kwk, kwv, kbq, kbk, kbv = jax.random.split(key, 7)

    x = jax.random.normal(kx, (B, S, D_in), dtype=jnp.float32)

    # Deterministic param init mimicking nn.Linear: U(-1/sqrt(fan_in), 1/sqrt(fan_in))
    bound = 1.0 / math.sqrt(D_in)
    init = lambda k, shape: jax.random.uniform(k, shape, jnp.float32, -bound, bound)
    wq, wk, wv = init(kwq, (D_in, D_emb)), init(kwk, (D_in, D_emb)), init(kwv, (D_in, D_emb))
    bq, bk, bv = init(kbq, (D_emb,)), init(kbk, (D_emb,)), init(kbv, (D_emb,))

    out = jax.block_until_ready(attention_layer(x, wq, wk, wv, bq, bk, bv))

    ref = _reference(x, wq, wk, wv, bq, bk, bv)
    assert out.shape == (B, S, D_emb)
    # tolerance accommodates the approximate (EUP) reciprocal in the softmax denom
    assert jnp.allclose(out, ref, atol=2e-3, rtol=2e-3), "mismatch vs JAX reference"

    print("KERNEL_OK")
</pallas_src>

<mosaic_0001>
module attributes {stable_mosaic.version = 11 : i64} {
  func.func @_flash_attn_kernel(%arg0: i32, %arg1: i32, %arg2: i32, %arg3: memref<2x8x32xf32, #tpu.memory_space<vmem>>, %arg4: memref<2x8x32xf32, #tpu.memory_space<vmem>>, %arg5: memref<32x32xf32, #tpu.memory_space<vmem>>, %arg6: memref<32x64xf32, #tpu.memory_space<vmem>>, %arg7: memref<1x32xf32, #tpu.memory_space<vmem>>, %arg8: memref<1x64xf32, #tpu.memory_space<vmem>>, %arg9: memref<2x8x32xf32, #tpu.memory_space<vmem>>, %arg10: memref<2x8x32xf32, #tpu.memory_space<vmem>>, %arg11: memref<2x8x1xf32, #tpu.memory_space<vmem>>, %arg12: memref<2x8x1xf32, #tpu.memory_space<vmem>>, %arg13: memref<2x8x32xf32, #tpu.memory_space<vmem>>) attributes {dimension_semantics = [#tpu.dimension_semantics<parallel>, #tpu.dimension_semantics<parallel>, #tpu.dimension_semantics<arbitrary>], iteration_bounds = array<i64: 1, 1, 1>, scalar_prefetch = 0 : i64, scratch_operands = 4 : i64, tpu.core_type = #tpu.core_type<tc>, window_params = [{transform_indices = @transform_0, window_bounds = array<i64: 2, 8, 32>}, {transform_indices = @transform_1, window_bounds = array<i64: 2, 8, 32>}, {pipeline_mode = #tpu.pipeline_mode<synchronous>, transform_indices = @transform_2, window_bounds = array<i64: 32, 32>}, {pipeline_mode = #tpu.pipeline_mode<synchronous>, transform_indices = @transform_3, window_bounds = array<i64: 32, 64>}, {pipeline_mode = #tpu.pipeline_mode<synchronous>, transform_indices = @transform_4, window_bounds = array<i64: 1, 32>}, {pipeline_mode = #tpu.pipeline_mode<synchronous>, transform_indices = @transform_5, window_bounds = array<i64: 1, 64>}, {transform_indices = @transform_6, window_bounds = array<i64: 2, 8, 32>}]} {
    %c0_i32 = arith.constant 0 : i32
    %0 = arith.cmpi eq, %arg2, %c0_i32 : i32
    %1 = arith.extui %0 : i1 to i32
    %c0_i32_0 = arith.constant 0 : i32
    %2 = arith.cmpi ne, %1, %c0_i32_0 : i32
    scf.if %2 {
      %c0_34 = arith.constant 0 : index
      %c0_35 = arith.constant 0 : index
      %c0_36 = arith.constant 0 : index
      %41 = vector.load %arg3[%c0_34, %c0_35, %c0_36] : memref<2x8x32xf32, #tpu.memory_space<vmem>>, vector<2x8x32xf32>
      %42 = vector.shape_cast %41 : vector<2x8x32xf32> to vector<16x32xf32>
      %c0_37 = arith.constant 0 : index
      %c0_38 = arith.constant 0 : index
      %43 = vector.load %arg5[%c0_37, %c0_38] : memref<32x32xf32, #tpu.memory_space<vmem>>, vector<32x32xf32>
      %cst_39 = arith.constant dense<0.000000e+00> : vector<16x32xf32>
      %44 = tpu.matmul %42, %43, %cst_39 {dimension_numbers = #tpu.dot_dimension_numbers<[1], [0], [0], [1], [0, 0, 1, 1], [], []>} : vector<16x32xf32>, vector<32x32xf32>, vector<16x32xf32> -> vector<16x32xf32>
      %c0_40 = arith.constant 0 : index
      %c0_41 = arith.constant 0 : index
      %45 = vector.load %arg7[%c0_40, %c0_41] : memref<1x32xf32, #tpu.memory_space<vmem>>, vector<1x32xf32>
      %46 = vector.broadcast %45 : vector<1x32xf32> to vector<16x32xf32>
      %47 = arith.addf %44, %46 : vector<16x32xf32>
      %cst_42 = arith.constant 0.176776692 : f32
      %48 = vector.broadcast %cst_42 : f32 to vector<16x32xf32>
      %49 = arith.mulf %47, %48 : vector<16x32xf32>
      %50 = vector.shape_cast %49 : vector<16x32xf32> to vector<2x8x32xf32>
      %c0_43 = arith.constant 0 : index
      %c0_44 = arith.constant 0 : index
      %c0_45 = arith.constant 0 : index
      %51 = vector.load %arg10[%c0_43, %c0_44, %c0_45] : memref<2x8x32xf32, #tpu.memory_space<vmem>>, vector<2x8x32xf32>
      tpu.vector_store %arg10[%c0_43, %c0_44, %c0_45], %50 {strides = array<i32>} : memref<2x8x32xf32, #tpu.memory_space<vmem>>, vector<2x8x32xf32>,
      %cst_46 = arith.constant 0xFF800000 : f32
      %52 = vector.broadcast %cst_46 : f32 to vector<2x8x1xf32>
      %c0_47 = arith.constant 0 : index
      %c0_48 = arith.constant 0 : index
      %c0_49 = arith.constant 0 : index
      %53 = vector.load %arg11[%c0_47, %c0_48, %c0_49] : memref<2x8x1xf32, #tpu.memory_space<vmem>>, vector<2x8x1xf32>
      tpu.vector_store %arg11[%c0_47, %c0_48, %c0_49], %52 {strides = array<i32>} : memref<2x8x1xf32, #tpu.memory_space<vmem>>, vector<2x8x1xf32>,
      %cst_50 = arith.constant 0.000000e+00 : f32
      %54 = vector.broadcast %cst_50 : f32 to vector<2x8x1xf32>
      %c0_51 = arith.constant 0 : index
      %c0_52 = arith.constant 0 : index
      %c0_53 = arith.constant 0 : index
      %55 = vector.load %arg12[%c0_51, %c0_52, %c0_53] : memref<2x8x1xf32, #tpu.memory_space<vmem>>, vector<2x8x1xf32>
      tpu.vector_store %arg12[%c0_51, %c0_52, %c0_53], %54 {strides = array<i32>} : memref<2x8x1xf32, #tpu.memory_space<vmem>>, vector<2x8x1xf32>,
      %cst_54 = arith.constant 0.000000e+00 : f32
      %56 = vector.broadcast %cst_54 : f32 to vector<2x8x32xf32>
      %c0_55 = arith.constant 0 : index
      %c0_56 = arith.constant 0 : index
      %c0_57 = arith.constant 0 : index
      %57 = vector.load %arg13[%c0_55, %c0_56, %c0_57] : memref<2x8x32xf32, #tpu.memory_space<vmem>>, vector<2x8x32xf32>
      tpu.vector_store %arg13[%c0_55, %c0_56, %c0_57], %56 {strides = array<i32>} : memref<2x8x32xf32, #tpu.memory_space<vmem>>, vector<2x8x32xf32>,
    } else {
    }
    %c0 = arith.constant 0 : index
    %c0_1 = arith.constant 0 : index
    %c0_2 = arith.constant 0 : index
    %3 = vector.load %arg4[%c0, %c0_1, %c0_2] : memref<2x8x32xf32, #tpu.memory_space<vmem>>, vector<2x8x32xf32>
    %4 = vector.shape_cast %3 : vector<2x8x32xf32> to vector<16x32xf32>
    %c0_3 = arith.constant 0 : index
    %c0_4 = arith.constant 0 : index
    %5 = vector.load %arg6[%c0_3, %c0_4] : memref<32x64xf32, #tpu.memory_space<vmem>>, vector<32x64xf32>
    %cst = arith.constant dense<0.000000e+00> : vector<16x64xf32>
    %6 = tpu.matmul %4, %5, %cst {dimension_numbers = #tpu.dot_dimension_numbers<[1], [0], [0], [1], [0, 0, 1, 1], [], []>} : vector<16x32xf32>, vector<32x64xf32>, vector<16x64xf32> -> vector<16x64xf32>
    %c0_5 = arith.constant 0 : index
    %c0_6 = arith.constant 0 : index
    %7 = vector.load %arg8[%c0_5, %c0_6] : memref<1x64xf32, #tpu.memory_space<vmem>>, vector<1x64xf32>
    %8 = vector.broadcast %7 : vector<1x64xf32> to vector<16x64xf32>
    %9 = arith.addf %6, %8 : vector<16x64xf32>
    %10 = vector.extract_strided_slice %9 {offsets = [0, 0], sizes = [16, 32], strides = [1, 1]} : vector<16x64xf32> to vector<16x32xf32>
    %11 = vector.shape_cast %10 : vector<16x32xf32> to vector<2x8x32xf32>
    %12 = vector.extract_strided_slice %9 {offsets = [0, 32], sizes = [16, 32], strides = [1, 1]} : vector<16x64xf32> to vector<16x32xf32>
    %13 = vector.shape_cast %12 : vector<16x32xf32> to vector<2x8x32xf32>
    %c0_7 = arith.constant 0 : index
    %c0_8 = arith.constant 0 : index
    %c0_9 = arith.constant 0 : index
    %14 = vector.load %arg10[%c0_7, %c0_8, %c0_9] : memref<2x8x32xf32, #tpu.memory_space<vmem>>, vector<2x8x32xf32>
    "tpu.trace_start"() <{level = 10 : i32, message = "bqd,bkd->bqk"}> : () -> ()
    %cst_10 = arith.constant dense<0.000000e+00> : vector<2x8x8xf32>
    %15 = tpu.matmul %14, %11, %cst_10 {dimension_numbers = #tpu.dot_dimension_numbers<[2], [2], [1], [1], [0, 0, 0, 1, 1, 1], [0], [0]>} : vector<2x8x32xf32>, vector<2x8x32xf32>, vector<2x8x8xf32> -> vector<2x8x8xf32>
    "tpu.trace_stop"() : () -> ()
    %c0_11 = arith.constant 0 : index
    %c0_12 = arith.constant 0 : index
    %c0_13 = arith.constant 0 : index
    %16 = vector.load %arg11[%c0_11, %c0_12, %c0_13] : memref<2x8x1xf32, #tpu.memory_space<vmem>>, vector<2x8x1xf32>
    %cst_14 = arith.constant dense<0xFF800000> : vector<2x8xf32>
    %17 = vector.multi_reduction <maximumf>, %15, %cst_14 [2] : vector<2x8x8xf32> to vector<2x8xf32>
    %18 = vector.shape_cast %17 : vector<2x8xf32> to vector<2x8x1xf32>
    %19 = arith.maximumf %16, %18 : vector<2x8x1xf32>
    %20 = arith.subf %16, %19 : vector<2x8x1xf32>
    %21 = math.exp %20 : vector<2x8x1xf32>
    %22 = vector.broadcast %19 : vector<2x8x1xf32> to vector<2x8x8xf32>
    %23 = arith.subf %15, %22 : vector<2x8x8xf32>
    %24 = math.exp %23 : vector<2x8x8xf32>
    %c0_15 = arith.constant 0 : index
    %c0_16 = arith.constant 0 : index
    %c0_17 = arith.constant 0 : index
    %25 = vector.load %arg12[%c0_15, %c0_16, %c0_17] : memref<2x8x1xf32, #tpu.memory_space<vmem>>, vector<2x8x1xf32>
    %26 = arith.mulf %21, %25 : vector<2x8x1xf32>
    %cst_18 = arith.constant dense<0.000000e+00> : vector<2x8xf32>
    %27 = vector.multi_reduction <add>, %24, %cst_18 [2] : vector<2x8x8xf32> to vector<2x8xf32>
    %28 = vector.shape_cast %27 : vector<2x8xf32> to vector<2x8x1xf32>
    %29 = arith.addf %26, %28 : vector<2x8x1xf32>
    %c0_19 = arith.constant 0 : index
    %c0_20 = arith.constant 0 : index
    %c0_21 = arith.constant 0 : index
    %30 = vector.load %arg12[%c0_19, %c0_20, %c0_21] : memref<2x8x1xf32, #tpu.memory_space<vmem>>, vector<2x8x1xf32>
    tpu.vector_store %arg12[%c0_19, %c0_20, %c0_21], %29 {strides = array<i32>} : memref<2x8x1xf32, #tpu.memory_space<vmem>>, vector<2x8x1xf32>,
    %c0_22 = arith.constant 0 : index
    %c0_23 = arith.constant 0 : index
    %c0_24 = arith.constant 0 : index
    %31 = vector.load %arg13[%c0_22, %c0_23, %c0_24] : memref<2x8x32xf32, #tpu.memory_space<vmem>>, vector<2x8x32xf32>
    %32 = vector.broadcast %21 : vector<2x8x1xf32> to vector<2x8x32xf32>
    %33 = arith.mulf %32, %31 : vector<2x8x32xf32>
    "tpu.trace_start"() <{level = 10 : i32, message = "bqk,bkd->bqd"}> : () -> ()
    %cst_25 = arith.constant dense<0.000000e+00> : vector<2x8x32xf32>
    %34 = tpu.matmul %24, %13, %cst_25 {dimension_numbers = #tpu.dot_dimension_numbers<[2], [1], [1], [2], [0, 0, 0, 1, 1, 2], [0], [0]>} : vector<2x8x8xf32>, vector<2x8x32xf32>, vector<2x8x32xf32> -> vector<2x8x32xf32>
    "tpu.trace_stop"() : () -> ()
    %35 = arith.addf %33, %34 : vector<2x8x32xf32>
    %c0_26 = arith.constant 0 : index
    %c0_27 = arith.constant 0 : index
    %c0_28 = arith.constant 0 : index
    %36 = vector.load %arg13[%c0_26, %c0_27, %c0_28] : memref<2x8x32xf32, #tpu.memory_space<vmem>>, vector<2x8x32xf32>
    tpu.vector_store %arg13[%c0_26, %c0_27, %c0_28], %35 {strides = array<i32>} : memref<2x8x32xf32, #tpu.memory_space<vmem>>, vector<2x8x32xf32>,
    %c0_29 = arith.constant 0 : index
    %c0_30 = arith.constant 0 : index
    %c0_31 = arith.constant 0 : index
    %37 = vector.load %arg11[%c0_29, %c0_30, %c0_31] : memref<2x8x1xf32, #tpu.memory_space<vmem>>, vector<2x8x1xf32>
    tpu.vector_store %arg11[%c0_29, %c0_30, %c0_31], %19 {strides = array<i32>} : memref<2x8x1xf32, #tpu.memory_space<vmem>>, vector<2x8x1xf32>,
    %c0_i32_32 = arith.constant 0 : i32
    %38 = arith.cmpi eq, %arg2, %c0_i32_32 : i32
    %39 = arith.extui %38 : i1 to i32
    %c0_i32_33 = arith.constant 0 : i32
    %40 = arith.cmpi ne, %39, %c0_i32_33 : i32
    scf.if %40 {
      %c0_34 = arith.constant 0 : index
      %c0_35 = arith.constant 0 : index
      %c0_36 = arith.constant 0 : index
      %41 = vector.load %arg12[%c0_34, %c0_35, %c0_36] : memref<2x8x1xf32, #tpu.memory_space<vmem>>, vector<2x8x1xf32>
      %42 = tpu.reciprocal %41 {approx = true} : vector<2x8x1xf32> -> vector<2x8x1xf32>
      %c0_37 = arith.constant 0 : index
      %c0_38 = arith.constant 0 : index
      %c0_39 = arith.constant 0 : index
      %43 = vector.load %arg13[%c0_37, %c0_38, %c0_39] : memref<2x8x32xf32, #tpu.memory_space<vmem>>, vector<2x8x32xf32>
      %44 = vector.broadcast %42 : vector<2x8x1xf32> to vector<2x8x32xf32>
      %45 = arith.mulf %43, %44 : vector<2x8x32xf32>
      %c0_40 = arith.constant 0 : index
      %c0_41 = arith.constant 0 : index
      %c0_42 = arith.constant 0 : index
      %46 = vector.load %arg9[%c0_40, %c0_41, %c0_42] : memref<2x8x32xf32, #tpu.memory_space<vmem>>, vector<2x8x32xf32>
      tpu.vector_store %arg9[%c0_40, %c0_41, %c0_42], %45 {strides = array<i32>} : memref<2x8x32xf32, #tpu.memory_space<vmem>>, vector<2x8x32xf32>,
    } else {
    }
    return
  }
  func.func @transform_0(%arg0: i32, %arg1: i32, %arg2: i32) -> (i32, i32, i32) {
    %c0_i32 = arith.constant 0 : i32
    %c0_i32_0 = arith.constant 0 : i32
    return %arg0, %arg1, %c0_i32 : i32, i32, i32
  }
  func.func @transform_1(%arg0: i32, %arg1: i32, %arg2: i32) -> (i32, i32, i32) {
    %c0_i32 = arith.constant 0 : i32
    %c0_i32_0 = arith.constant 0 : i32
    return %arg0, %arg2, %c0_i32 : i32, i32, i32
  }
  func.func @transform_2(%arg0: i32, %arg1: i32, %arg2: i32) -> (i32, i32) {
    %c0_i32 = arith.constant 0 : i32
    %c0_i32_0 = arith.constant 0 : i32
    %c0_i32_1 = arith.constant 0 : i32
    return %c0_i32, %c0_i32_0 : i32, i32
  }
  func.func @transform_3(%arg0: i32, %arg1: i32, %arg2: i32) -> (i32, i32) {
    %c0_i32 = arith.constant 0 : i32
    %c0_i32_0 = arith.constant 0 : i32
    %c0_i32_1 = arith.constant 0 : i32
    return %c0_i32, %c0_i32_0 : i32, i32
  }
  func.func @transform_4(%arg0: i32, %arg1: i32, %arg2: i32) -> (i32, i32) {
    %c0_i32 = arith.constant 0 : i32
    %c0_i32_0 = arith.constant 0 : i32
    %c0_i32_1 = arith.constant 0 : i32
    return %c0_i32, %c0_i32_0 : i32, i32
  }
  func.func @transform_5(%arg0: i32, %arg1: i32, %arg2: i32) -> (i32, i32) {
    %c0_i32 = arith.constant 0 : i32
    %c0_i32_0 = arith.constant 0 : i32
    %c0_i32_1 = arith.constant 0 : i32
    return %c0_i32, %c0_i32_0 : i32, i32
  }
  func.func @transform_6(%arg0: i32, %arg1: i32, %arg2: i32) -> (i32, i32, i32) {
    %c0_i32 = arith.constant 0 : i32
    %c0_i32_0 = arith.constant 0 : i32
    return %arg0, %arg1, %c0_i32 : i32, i32, i32
  }
}

</mosaic_0001>

<bundles_post_ra>
// kernel: tpu_custom_call.1
= control target key start
LH: loop header
LB: loop body
LE: loop exit
PB: predicated region body
PF: predicated region fallthrough
CT: control target
= control target key end

     0   :  { %11 = vsyncpa [#allocation7], 0  ;;  %s1110_s0 = inlined_call_operand.hbm [shape: f32[2,8,32], index: 0, kind: input, shape index: {}]   ;;  %s1111_s1 = inlined_call_operand.hbm [shape: f32[2,8,32], index: 1, kind: input, shape index: {}]   ;;  %s1112_s2 = inlined_call_operand.hbm [shape: f32[32,32], index: 2, kind: input, shape index: {}]   ;;  %s1113_s3 = inlined_call_operand.hbm [shape: f32[32,64], index: 3, kind: input, shape index: {}]   ;;  %s1114_s4 = inlined_call_operand.vmem [shape: f32[1,32], index: 4, kind: input, shape index: {}]   ;;  %s1115_s5 = inlined_call_operand.vmem [shape: f32[1,64], index: 5, kind: input, shape index: {}]   ;;  %s1116_s6 = inlined_call_operand.hbm [shape: f32[2,8,32], index: 6, kind: output, shape index: {}]  }
   0x1   :  { %12 = vsyncpa [#allocation10], 0 }
   0x2   :  { %13 = vsyncpa [#allocation13], 0 }
   0x3   :  { %14 = vsyncpa [#allocation8], 0  ;;  %s934_s21 = smov [#allocation9]   ;;  %s935_s23 = smov [#allocation6]  }
   0x4   :  { %s32_s22 = sshll.u32 %s934_s21, 4  ;;  %s20_s24 = sshll.u32 %s935_s23, 4  ;;  %s33_s22 = int_to_ptr.vmem [resolvable:$true] %s32_s22  ;;  %s981_s24 = int_to_ptr.vmem [resolvable:$true] %s20_s24 }
   0x5   :  { %s816_s27 = scalar_lea.hbm %s1111_s1, 256 }
   0x6   :  { %p817_p0 = scmp.ne.s32.totalorder %s1111_s1, %s816_s27  ;;  %p820_p1 = scmp.lt.u32.totalorder %s816_s27, %s1111_s1 }
   0x8   :  { %p822_p2 = pnand %p820_p1, %p817_p0 }
   0xa   :  { %825 = shalt.err (!%p822_p2)
}
   0xb   :  { %s826_s8 = scalar_lea.vmem %s33_s22, 256  ;;  %p831_p4 = scmp.lt.s32.totalorder %s33_s22, %s33_s22 }
   0xc   :  { %p827_p3 = scmp.ne.s32.totalorder %s33_s22, %s826_s8  ;;  %p832_p5 = scmp.lt.s32.totalorder %s826_s8, %s826_s8 }
   0xe   :  { %p833_p6 = por %p832_p5, %p831_p4 }
  0x10   :  { %p834_p7 = pnand %p833_p6, %p827_p3 }
  0x12   :  { %837 = shalt.err (!%p834_p7)
}
  0x13   :  { %s936_s9 = smov 128   ;;  %s937_s10 = smov 8  }
  0x14   :  { %38 = dma.hbm_to_vmem [thread:$0]  %s1111_s1, 256, %s33_s22, [#allocation10], %s936_s9, %s936_s9, %s937_s10  }
  0x15   :  { %s838_s15 = scalar_lea.hbm %s1110_s0, 256 }
  0x16   :  { %p839_p8 = scmp.ne.s32.totalorder %s1110_s0, %s838_s15  ;;  %p842_p9 = scmp.lt.u32.totalorder %s838_s15, %s1110_s0 }
  0x18   :  { %p844_p10 = pnand %p842_p9, %p839_p8 }
  0x1a   :  { %847 = shalt.err (!%p844_p10)
}
  0x1b   :  { %s848_s20 = scalar_lea.vmem %s981_s24, 256  ;;  %p853_p12 = scmp.lt.s32.totalorder %s981_s24, %s981_s24 }
  0x1c   :  { %p849_p11 = scmp.ne.s32.totalorder %s981_s24, %s848_s20  ;;  %p854_p13 = scmp.lt.s32.totalorder %s848_s20, %s848_s20 }
  0x1e   :  { %p855_p0 = por %p854_p13, %p853_p12 }
  0x20   :  { %p856_p1 = pnand %p855_p0, %p849_p11 }
  0x22   :  { %859 = shalt.err (!%p856_p1)
}
  0x23   :  { %26 = dma.hbm_to_vmem [thread:$0]  %s1110_s0, 256, %s981_s24, [#allocation7], %s936_s9, %s936_s9, %s937_s10  }
  0x24   :  { %s938_s22 = smov [#allocation11]   ;;  %s939_s25 = smov [#allocation12]  }
  0x25   :  { %s44_s23 = sshll.u32 %s938_s22, 4  ;;  %s56_s26 = sshll.u32 %s939_s25, 4  ;;  %s45_s23 = int_to_ptr.vmem [resolvable:$true] %s44_s23  ;;  %s1018_s26 = int_to_ptr.vmem [resolvable:$true] %s56_s26 }
  0x26   :  { %s860_s29 = scalar_lea.hbm %s1112_s2, 512 }
  0x27   :  { %p861_p2 = scmp.ne.s32.totalorder %s1112_s2, %s860_s29  ;;  %p864_p3 = scmp.lt.u32.totalorder %s860_s29, %s1112_s2 }
  0x29   :  { %p866_p4 = pnand %p864_p3, %p861_p2 }
  0x2b   :  { %869 = shalt.err (!%p866_p4)
}
  0x2c   :  { %s870_s0 = scalar_lea.vmem %s45_s23, 512  ;;  %p875_p6 = scmp.lt.s32.totalorder %s45_s23, %s45_s23 }
  0x2d   :  { %p871_p5 = scmp.ne.s32.totalorder %s45_s23, %s870_s0  ;;  %p876_p7 = scmp.lt.s32.totalorder %s870_s0, %s870_s0 }
  0x2f   :  { %p877_p8 = por %p876_p7, %p875_p6 }
  0x31   :  { %p878_p9 = pnand %p877_p8, %p871_p5 }
  0x33   :  { %881 = shalt.err (!%p878_p9)
}
  0x34   :  { %50 = dma.hbm_to_vmem [thread:$0]  %s1112_s2, 512, %s45_s23, [#allocation10], %s936_s9, %s936_s9, %s937_s10  }
  0x35   :  { %s882_s15 = scalar_lea.hbm %s1113_s3, 512 }
  0x36   :  { %p883_p10 = scmp.ne.s32.totalorder %s1113_s3, %s882_s15  ;;  %p886_p11 = scmp.lt.u32.totalorder %s882_s15, %s1113_s3 }
  0x38   :  { %p888_p12 = pnand %p886_p11, %p883_p10 }
  0x3a   :  { %891 = shalt.err (!%p888_p12)
}
  0x3b   :  { %s892_s20 = scalar_lea.vmem %s1018_s26, 512  ;;  %p897_p0 = scmp.lt.s32.totalorder %s1018_s26, %s1018_s26 }
  0x3c   :  { %p893_p13 = scmp.ne.s32.totalorder %s1018_s26, %s892_s20  ;;  %p898_p1 = scmp.lt.s32.totalorder %s892_s20, %s892_s20 }
  0x3e   :  { %p899_p2 = por %p898_p1, %p897_p0 }
  0x40   :  { %p900_p3 = pnand %p899_p2, %p893_p13 }
  0x42   :  { %903 = shalt.err (!%p900_p3)
}
  0x43   :  { %62 = dma.hbm_to_vmem [thread:$0]  %s1113_s3, 512, %s1018_s26, [#allocation13], %s936_s9, %s936_s9, %s937_s10  }
  0x44   :  { %926 = dma.done.wait [#allocation7], 256  }
  0x45   :  { %927 = vsyncadd [#allocation7], 4294967040 }
  0x46   :  { %928 = dma.done.wait [#allocation10], 768  }
  0x47   :  { %929 = vsyncadd [#allocation10], 4294966528 }
  0x48   :  { %930 = dma.done.wait [#allocation13], 512  }
  0x49   :  { %931 = vsyncadd [#allocation13], 4294966784  ;;  %v85_v0 = vld [vmem:[#allocation11] sm:$0xff]  ;;  %v86_v1 = vld [vmem:[#allocation11 + $0x8] sm:$0xff]  ;;  %vm96_vm0 = vcmask 261120   ;;  %v940_v16 = vmov 0.0  }
  0x4a   :  { %v87_v2 = vld [vmem:[#allocation11 + $0x10] sm:$0xff]  ;;  %v774_v3 = vpack.c.bf16 %v86_v1, %v85_v0  ;;  %v88_v4 = vld [vmem:[#allocation11 + $0x18] sm:$0xff]  ;;  %v191_v5 = vld [vmem:[#allocation12] sm:$0xff]  ;;  %187 = vst.msk [vmem:[#allocation5] sm:$0xff] %vm96_vm0, %v940_v16  ;;  %vm941_vm1 = vmmov 0   ;;  %vm182_vm2 = vcmask 7168  }
  0x4b   :  { %v192_v6 = vld [vmem:[#allocation12 + $0x8] sm:$0xff]  ;;  %v778_v7 = vpack.c.bf16 %v88_v4, %v87_v2  ;;  %v83_v9 = vld [vmem:[#allocation6] sm:$0xff]  ;;  %v193_v10 = vld [vmem:[#allocation12 + $0x10] sm:$0xff]  ;;  %188 = vst.msk [vmem:[#allocation5 + $0x8] sm:$0xff] %vm96_vm0, %v940_v16  ;;  %v942_v31 = vmov -inf   ;;  %vm440_vm3 = vcmask 64512  }
  0x4c   :  { %v782_v8 = vpack.c.bf16 %v192_v6, %v191_v5  ;;  %775 = vmatprep.subr.bf16.mxu0 %v774_v3  ;;  %740 = vmatprep.mubr.msk.f32.mxu0 %vm96_vm0, %v83_v9  ;;  %v194_v11 = vld [vmem:[#allocation12 + $0x18] sm:$0xff]  ;;  %v189_v12 = vld [vmem:[#allocation9] sm:$0xff]  ;;  %v84_v14 = vld [vmem:[#allocation6 + $0x8] sm:$0xff]  ;;  %183 = vst.msk [vmem:[#allocation3] sm:$0xff] %vm182_vm2, %v942_v31  ;;  %v943_v38 = vmov 0  }
  0x4d   :  { %777 = vmatpush3.bf16.msra.mxu0 %v774_v3  ;;  %v786_v13 = vpack.c.bf16 %v194_v11, %v193_v10  ;;  %751 = vmatprep.mubr.msk.f32.mxu1 %vm96_vm0, %v189_v12  ;;  %v190_v15 = vld [vmem:[#allocation9 + $0x8] sm:$0xff]  ;;  %v700_v17 = vld [vmem:[%s1114_s4] ss:$0 sm:$0xff]  ;;  %184 = vst.msk [vmem:[#allocation3 + $0x8] sm:$0xff] %vm182_vm2, %v942_v31  ;;  %185 = vst.msk [vmem:[#allocation4] sm:$0xff] %vm182_vm2, %v940_v16  ;;  %s944_s4 = smov 96  }
  0x4e   :  { %783 = vmatprep.subr.bf16.mxu1 %v782_v8  ;;  %779 = vmatprep.subr.bf16.mxu0 %v778_v7  ;;  %v703_v18 = vld [vmem:[%s1115_s5] ss:$0 sm:$0xff]  ;;  %186 = vst.msk [vmem:[#allocation4 + $0x8] sm:$0xff] %vm182_vm2, %v940_v16  ;;  %s945_s5 = smov [#allocation14]  }
  0x4f   :  { %785 = vmatpush3.bf16.msra.mxu1 %v782_v8  ;;  %802 = vset.pattern.permute.xlu1 %v943_v38  ;;  %s686_s25 = sshll.u32 %s945_s5, 4  ;;  %s687_s25 = int_to_ptr.vmem [resolvable:$true] %s686_s25 }
  0x50   :  { %787 = vmatprep.subr.bf16.mxu1 %v786_v13  ;;  %803 = vset.pattern.permute.xlu0 %v943_v38  ;;  %s904_s26 = scalar_lea.vmem %s687_s25, 256  ;;  %p909_p5 = scmp.lt.s32.totalorder %s687_s25, %s687_s25 }
  0x51   :  { %781 = vmatpush3.bf16.msra.mxu0 %v778_v7  ;;  %v486_v11 = vld [vmem:[#allocation5] sm:$0xff]  ;;  %p905_p4 = scmp.ne.s32.totalorder %s687_s25, %s904_s26  ;;  %p910_p6 = scmp.lt.s32.totalorder %s904_s26, %s904_s26 }
  0x52   :  { %754 = vmatprep.subr.mxu0 %v940_v16 }
  0x53   :  { %789 = vmatpush3.bf16.msra.mxu1 %v786_v13  ;;  %v438_v39 = vld [vmem:[#allocation3] sm:$0xff]  ;;  %p911_p7 = por %p910_p6, %p909_p5 }
  0x54   :  { %741 = vmatmul.mubr.msk.f32.vlgmr.msra.gmra.mrb[0].mxu0 %vm96_vm0, %v84_v14  ;;  %759 = vmatprep.subr.mxu1 %v940_v16  ;;  %v439_v42 = vld [vmem:[#allocation3 + $0x8] sm:$0xff]  ;;  %v471_v63 = vld [vmem:[#allocation4] sm:$0xff] }
  0x55   :  { %756 = vmatprep.mubr.msk.f32.mxu0 %vm941_vm1, %v940_v16  ;;  %v472_v2 = vld [vmem:[#allocation4 + $0x8] sm:$0xff]  ;;  %v487_v14 = vld [vmem:[#allocation5 + $0x8] sm:$0xff]  ;;  %p912_p8 = pnand %p911_p7, %p905_p4 }
  0x56   :  { %752 = vmatmul.mubr.msk.f32.vlgmr.msra.gmra.mrb[0].mxu1 %vm96_vm0, %v190_v15 }
  0x57   :  { %761 = vmatprep.mubr.msk.f32.mxu1 %vm941_vm1, %v940_v16 }
 0x127   :  { %v742_v19 = vpop.f32.mrb[0].mxu0 }
 0x128   :  { %v175_v20 = vadd.f32 %v742_v19, %v700_v17  ;;  %v169_v21 = vpop.f32.mrb[1].mxu0 }
 0x129   :  { %v753_v22 = vpop.f32.mrb[0].mxu1  ;;  %v170_v23 = vadd.f32 %v700_v17, %v169_v21 }
 0x12a   :  { %v281_v24 = vadd.f32 %v753_v22, %v703_v18  ;;  %v275_v25 = vpop.f32.mrb[1].mxu1  ;;  %v179_v26 = vmul.f32 0.17677669, %v175_v20 }
 0x12b   :  { %v276_v27 = vadd.f32 %v703_v18, %v275_v25  ;;  %v178_v28 = vmul.f32 0.17677669, %v170_v23 }
 0x12c   :  { %760 = vmatpush3.xpose.msk.msra.mxu1 %vm96_vm0, %v281_v24  ;;  %181 = vst.msk [vmem:[#allocation2 + $0x8] sm:$0xff] %vm96_vm0, %v179_v26 }
 0x12d   :  { %755 = vmatpush3.xpose.msk.msra.mxu0 %vm96_vm0, %v276_v27  ;;  %769 = vmatprep.subr.mxu1 %v940_v16  ;;  %180 = vst.msk [vmem:[#allocation2] sm:$0xff] %vm96_vm0, %v178_v28 }
 0x12e   :  { %764 = vmatprep.subr.mxu0 %v940_v16 }
 0x133   :  { %v285_v29 = vld [vmem:[#allocation2 + $0x8] sm:$0xff] }
 0x134   :  { %762 = vmatmul.mubr.msk.f32.vlgmr.msra.gmra.mrb[2].mxu1 %vm96_vm0, %v285_v29  ;;  %v284_v30 = vld [vmem:[#allocation2] sm:$0xff] }
 0x135   :  { %757 = vmatmul.mubr.msk.f32.vlgmr.msra.gmra.mrb[2].mxu0 %vm96_vm0, %v284_v30  ;;  %771 = vmatprep.mubr.msk.f32.mxu1 %vm941_vm1, %v940_v16 }
 0x136   :  { %766 = vmatprep.mubr.msk.f32.mxu0 %vm941_vm1, %v940_v16 }
 0x207   :  { %v434_v32 = vpop.f32.mrb[2].mxu1 }
 0x208   :  { %v358_v33 = vpop.f32.mrb[2].mxu0  ;;  %v763_v34 = vpop.f32.mrb[3].mxu1  ;;  %v444_v37 = vsel %vm440_vm3, %v434_v32, -inf }
 0x209   :  { %v758_v35 = vpop.f32.mrb[3].mxu0  ;;  %v441_v36 = vsel %vm440_vm3, %v358_v33, -inf }
 0x20a   :  { %442 = vmax.xlane.f32.xlu0 %v441_v36 }
 0x20e   :  { %445 = vmax.xlane.f32.xlu0 %v444_v37 }
 0x224   :  { %500 = vrot.lane.b32.xlu0 %v276_v27, %s944_s4 }
 0x297   :  { %v443_v40 = vpop.xlane.xlu0 %442 }
 0x298   :  { %v447_v41 = vmax.f32 %v438_v39, %v443_v40 }
 0x29a   :  { %v449_v43 = vsub.f32 %v438_v39, %v447_v41  ;;  %656 = vst.msk [vmem:[#allocation3] sm:$0xff] %vm182_vm2, %v447_v41  ;;  %457 = vperm.xlu1 %802, %v447_v41  }
 0x29b   :  { %v446_v44 = vpop.xlane.xlu0 %445 }
 0x29c   :  { %v448_v45 = vmax.f32 %v439_v42, %v446_v44  ;;  %v451_v58 = vmul.f32 1.442695, %v449_v43 }
 0x29e   :  { %v450_v46 = vsub.f32 %v439_v42, %v448_v45  ;;  %657 = vst.msk [vmem:[#allocation3 + $0x8] sm:$0xff] %vm182_vm2, %v448_v45  ;;  %462 = vperm.xlu1 %802, %v448_v45  }
 0x29f   :  { %v501_v47 = vpop.permute.xlu0 %500 }
 0x2a0   :  { %765 = vmatpush3.msra.mxu0 %v501_v47  ;;  %v453_v60 = vmul.f32 1.442695, %v450_v46 }
 0x2a2   :  { %576 = vrot.lane.b32.xlu1 %v281_v24, %s944_s4 }
 0x319   :  { %v458_v48 = vpop.permute.xlu1 %457 }
 0x31a   :  { %v465_v49 = vsub.f32 %v358_v33, %v458_v48 }
 0x31c   :  { %v467_v50 = vmul.f32 1.442695, %v465_v49 }
 0x31d   :  { %v463_v51 = vpop.permute.xlu1 %462 }
 0x31e   :  { %804 = vpow2.f32 %v467_v50  ;;  %v466_v52 = vsub.f32 %v434_v32, %v463_v51 }
 0x320   :  { %v469_v53 = vmul.f32 1.442695, %v466_v52 }
 0x321   :  { %v577_v54 = vpop.permute.xlu1 %576 }
 0x322   :  { %806 = vpow2.f32 %v469_v53  ;;  %770 = vmatpush3.msra.mxu1 %v577_v54 }
 0x323   :  { %808 = vpow2.f32 %v451_v58 }
 0x324   :  { %810 = vpow2.f32 %v453_v60 }
 0x328   :  { %v805_v55 = vpop.eup %804 }
 0x329   :  { %767 = vmatmul.mubr.msk.f32.vlgmr.msra.gmra.mrb[4].mxu0 %vm440_vm3, %v805_v55  ;;  %v475_v56 = vsel %vm440_vm3, %v805_v55, 0.0 }
 0x32a   :  { %476 = vadd.xlane.f32.xlu1 %v475_v56 }
 0x32c   :  { %v807_v57 = vpop.eup %806 }
 0x32d   :  { %772 = vmatmul.mubr.msk.f32.vlgmr.msra.gmra.mrb[4].mxu1 %vm440_vm3, %v807_v57  ;;  %v478_v59 = vsel %vm440_vm3, %v807_v57, 0.0  ;;  %v809_v61 = vpop.eup %808 }
 0x32e   :  { %479 = vadd.xlane.f32.xlu0 %v478_v59  ;;  %v811_v62 = vpop.eup %810  ;;  %v473_v0 = vmul.f32 %v809_v61, %v471_v63 }
 0x32f   :  { %v474_v4 = vmul.f32 %v811_v62, %v472_v2 }
 0x33b   :  { %490 = vperm.xlu1 %802, %v809_v61  }
 0x344   :  { %495 = vperm.xlu0 %803, %v811_v62  }
 0x3b7   :  { %v477_v1 = vpop.xlane.xlu1 %476 }
 0x3b8   :  { %v481_v3 = vadd.f32 %v477_v1, %v473_v0 }
 0x3ba   :  { %484 = vst.msk [vmem:[#allocation4] sm:$0xff] %vm182_vm2, %v481_v3 }
 0x3bb   :  { %v480_v5 = vpop.xlane.xlu0 %479  ;;  %v491_v12 = vpop.permute.xlu1 %490 }
 0x3bc   :  { %v482_v6 = vadd.f32 %v480_v5, %v474_v4  ;;  %v498_v13 = vmul.f32 %v491_v12, %v486_v11 }
 0x3be   :  { %485 = vst.msk [vmem:[#allocation4 + $0x8] sm:$0xff] %vm182_vm2, %v482_v6 }
 0x3c1   :  { %v661_v7 = vld [vmem:[#allocation4] sm:$0xff] }
 0x3c2   :  { %812 = vrcp.f32 %v661_v7 }
 0x3c3   :  { %v496_v15 = vpop.permute.xlu0 %495 }
 0x3c4   :  { %v499_v19 = vmul.f32 %v496_v15, %v487_v14 }
 0x3c5   :  { %v662_v8 = vld [vmem:[#allocation4 + $0x8] sm:$0xff] }
 0x3c6   :  { %814 = vrcp.f32 %v662_v8 }
 0x3cc   :  { %v813_v9 = vpop.eup %812 }
 0x3cd   :  { %669 = vperm.xlu1 %802, %v813_v9  }
 0x3d0   :  { %v815_v10 = vpop.eup %814 }
 0x3d1   :  { %674 = vperm.xlu1 %802, %v815_v10  }
 0x3fc   :  { %v572_v16 = vpop.f32.mrb[4].mxu0 }
 0x3fd   :  { %v652_v17 = vadd.f32 %v572_v16, %v498_v13  ;;  %v768_v18 = vpop.f32.mrb[5].mxu0 }
 0x3ff   :  { %654 = vst.msk [vmem:[#allocation5] sm:$0xff] %vm96_vm0, %v652_v17 }
 0x400   :  { %v648_v20 = vpop.f32.mrb[4].mxu1 }
 0x401   :  { %v653_v21 = vadd.f32 %v648_v20, %v499_v19  ;;  %v773_v22 = vpop.f32.mrb[5].mxu1 }
 0x403   :  { %655 = vst.msk [vmem:[#allocation5 + $0x8] sm:$0xff] %vm96_vm0, %v653_v21 }
 0x406   :  { %v665_v24 = vld [vmem:[#allocation5] sm:$0xff] }
 0x40a   :  { %v666_v27 = vld [vmem:[#allocation5 + $0x8] sm:$0xff] }
 0x44c   :  { %v670_v23 = vpop.permute.xlu1 %669 }
 0x44d   :  { %v677_v25 = vmul.f32 %v670_v23, %v665_v24 }
 0x44f   :  { %679 = vst.msk [vmem:[#allocation14] sm:$0xff] %vm96_vm0, %v677_v25 }
 0x450   :  { %v675_v26 = vpop.permute.xlu1 %674 }
 0x451   :  { %v678_v28 = vmul.f32 %v675_v26, %v666_v27 }
 0x453   :  { %680 = vst.msk [vmem:[#allocation14 + $0x8] sm:$0xff] %vm96_vm0, %v678_v28 }
 0x454   :  { %915 = shalt.err (!%p912_p8)
}
 0x455   :  { %s916_s29 = scalar_lea.hbm %s1116_s6, 256 }
 0x456   :  { %p917_p9 = scmp.ne.s32.totalorder %s1116_s6, %s916_s29  ;;  %p920_p10 = scmp.lt.u32.totalorder %s916_s29, %s1116_s6 }
 0x458   :  { %p922_p11 = pnand %p920_p10, %p917_p9 }
 0x45a   :  { %925 = shalt.err (!%p922_p11)
}
 0x45b   :  { %692 = dma.vmem_to_hbm [thread:$0]  %s687_s25, 256, %s1116_s6, [#allocation8], %s936_s9, %s936_s9, %s937_s10  }
 0x45c   :  { %932 = dma.done.wait [#allocation8], 256  }
 0x45d   :  { %933 = vsyncadd [#allocation8], 4294967040 }
 0x45e   :  { %696 = vsyncpa [#allocation7], 1 }
 0x45f   :  { %697 = vsyncpa [#allocation10], 1 }
 0x460   :  { %698 = vsyncpa [#allocation13], 1 }
 0x461   :  { %699 = vsyncpa [#allocation8], 1 }

</bundles_post_ra>
